<compile_context>
chip_gen: v6e
topology: v6e:2x2x1
jax: 0.10.0
libtpu: 0.0.40
codegen_flags: <defaults>
</compile_context>

<pallas_src>
import math
from functools import partial

import jax
import jax.numpy as jnp
from jax import lax
from jax.experimental import pallas as pl
from jax.experimental.pallas import tpu as pltpu


# Large-but-finite mask value (NaN-proof; exp underflows to exactly 0 in f32).
DEFAULT_MASK_VALUE = -0.7 * float(jnp.finfo(jnp.float32).max)


def _round_up(x, m):
    return ((x + m - 1) // m) * m


def _pick_tile(n, candidates):
    """Largest candidate tile dividing n; falls back to full extent for small n."""
    for c in candidates:
        if n >= c and n % c == 0:
            return c
    return n


def _hw_params():
    """Generation-aware VMEM limit + tile candidates.
    v5e/v6e: 128 MiB VMEM -> 512-class projection tiles, 64 MiB scoped limit.
    v7x:      64 MiB VMEM -> 256-class tiles, 40 MiB scoped limit."""
    vmem_cap = 128 * 1024 * 1024
    try:
        vmem_cap = int(pltpu.get_tpu_info().vmem_capacity_bytes)
    except Exception:
        pass
    if vmem_cap >= 100 * 1024 * 1024:
        return {"vmem_limit": 64 * 1024 * 1024,
                "proj_tiles": (512, 256, 128),
                "attn_tiles": (256, 128)}
    return {"vmem_limit": 40 * 1024 * 1024,
            "proj_tiles": (256, 128),
            "attn_tiles": (256, 128)}


# --------------------------------------------------------------------------
# 1) QKV projection: one fused x @ [Wq|Wk|Wv]_head matmul per (batch, T-block,
#    head) grid step, writing q/k/v directly in (B, H, T, head_dim) layout.
#    q is pre-scaled by 1/sqrt(head_dim).
# --------------------------------------------------------------------------
def _qkv_proj_kernel(x_ref, w_ref, q_ref, k_ref, v_ref, *, scale, head_dim):
    x = x_ref[...]                                            # (tm, d_in), input dtype
    # Fused wide-N matmul (N = 3*head_dim) keeps the MXU weight pipeline hot.
    r = jnp.dot(x, w_ref[...], preferred_element_type=jnp.float32)   # (tm, 3*hd) f32
    q_ref[...] = (r[:, :head_dim] * scale).astype(q_ref.dtype)
    k_ref[...] = r[:, head_dim:2 * head_dim].astype(k_ref.dtype)
    v_ref[...] = r[:, 2 * head_dim:].astype(v_ref.dtype)


def _qkv_projection(x, wqkv, scale, *, num_heads, head_dim, hw):
    B, T, d_in = x.shape
    tm = _pick_tile(T, hw["proj_tiles"])
    grid = (B, T // tm, num_heads)        # head innermost: x block is re-used

    x_spec = pl.BlockSpec((pl.Squeezed(), tm, d_in), lambda b, i, h: (b, i, 0))
    w_spec = pl.BlockSpec((pl.Squeezed(), d_in, 3 * head_dim),
                          lambda b, i, h: (h, 0, 0))
    o_spec = pl.BlockSpec((pl.Squeezed(), pl.Squeezed(), tm, head_dim),
                          lambda b, i, h: (b, h, i, 0))
    out_sds = jax.ShapeDtypeStruct((B, num_heads, T, head_dim), x.dtype)

    # TODO(synk): for very large d_in an extra K-tiling grid axis would bound the
    # x tile further; not needed for typical d_model with the tile caps above.
    return pl.pallas_call(
        partial(_qkv_proj_kernel, scale=scale, head_dim=head_dim),
        out_shape=(out_sds, out_sds, out_sds),
        grid_spec=pltpu.PrefetchScalarGridSpec(
            num_scalar_prefetch=0,
            grid=grid,
            in_specs=[x_spec, w_spec],
            out_specs=(o_spec, o_spec, o_spec),
        ),
        compiler_params=pltpu.CompilerParams(
            dimension_semantics=("parallel", "parallel", "parallel"),
            vmem_limit_bytes=hw["vmem_limit"]),
    )(x, wqkv)


# --------------------------------------------------------------------------
# 2) Causal flash attention over (B, H, q-blocks, kv-blocks) with online softmax.
#    q pre-scaled.  Fully-above-diagonal kv blocks: no DMA (clamped index_map)
#    and no compute; fully-below-diagonal blocks skip all masking work.
# --------------------------------------------------------------------------
def _flash_attn_kernel(q_ref, k_ref, v_ref, o_ref, m_sc, l_sc, acc_sc, *, tq, tk):
    qi = pl.program_id(2)
    ki = pl.program_id(3)

    @pl.when(ki == 0)
    def _init():
        m_sc[...] = jnp.full_like(m_sc, -jnp.inf)
        l_sc[...] = jnp.zeros_like(l_sc)
        acc_sc[...] = jnp.zeros_like(acc_sc)

    q_start = qi * tq
    k_start = ki * tk

    def _scores():
        # q @ k^T contracted on head_dim, f32 accumulate on the MXU.
        return lax.dot_general(q_ref[...], k_ref[...], (((1,), (1,)), ((), ())),
                               preferred_element_type=jnp.float32)   # (tq, tk)

    def _accumulate(s, causal_mask=None):
        m_prev = m_sc[...]                                            # (tq, 1) f32
        m_new = jnp.maximum(m_prev, jnp.max(s, axis=-1, keepdims=True))
        alpha = jnp.exp(m_prev - m_new)
        p = jnp.exp(s - m_new)                                        # (tq, tk) f32
        if causal_mask is not None:
            # Exact zeroing of masked probabilities: robust even if tq != tk
            # (fully-masked rows contribute exactly nothing).
            p = jnp.where(causal_mask, p, 0.0)
        l_sc[...] = alpha * l_sc[...] + jnp.sum(p, axis=-1, keepdims=True)
        acc_sc[...] = alpha * acc_sc[...] + jnp.dot(
            p.astype(v_ref.dtype), v_ref[...], preferred_element_type=jnp.float32)
        m_sc[...] = m_new

    # Fast path: kv block entirely at/below the diagonal -> no mask work at all.
    @pl.when(k_start + (tk - 1) <= q_start)
    def _unmasked():
        _accumulate(_scores())

    # Diagonal-straddling kv block -> causal mask.  Fully-above-diagonal blocks
    # run neither branch (compute skip; their DMA is also skipped via index_map).
    @pl.when(jnp.logical_and(k_start + (tk - 1) > q_start,
                             k_start <= q_start + (tq - 1)))
    def _masked():
        s = _scores()
        row = q_start + lax.broadcasted_iota(jnp.int32, (tq, tk), 0)
        col = k_start + lax.broadcasted_iota(jnp.int32, (tq, tk), 1)
        causal = col <= row
        s = jnp.where(causal, s, DEFAULT_MASK_VALUE)
        _accumulate(s, causal_mask=causal)

    @pl.when(ki == pl.num_programs(3) - 1)
    def _finalize():
        # approx=True -> EUP vrcp slot (otherwise idle in the epilogue).
        inv_l = pl.reciprocal(l_sc[...], approx=True)
        o_ref[...] = (acc_sc[...] * inv_l).astype(o_ref.dtype)


def _flash_attention(q, k, v, *, hw):
    """q, k, v: (B, H, T, head_dim); q pre-scaled.  Returns ctx (B, H, T, head_dim)."""
    B, H, T, hd = q.shape
    tq = _pick_tile(T, hw["attn_tiles"])
    tk = tq
    grid = (B, H, T // tq, T // tk)

    q_spec = pl.BlockSpec((pl.Squeezed(), pl.Squeezed(), tq, hd),
                          lambda b, h, i, j: (b, h, i, 0))
    o_spec = pl.BlockSpec((pl.Squeezed(), pl.Squeezed(), tq, hd),
                          lambda b, h, i, j: (b, h, i, 0))

    def kv_index(b, h, i, j):
        # Clamp fully-above-diagonal kv block indices onto the last causally
        # needed block -> block index repeats -> Pallas issues no new DMA.
        j_max = ((i + 1) * tq - 1) // tk
        return (b, h, jnp.minimum(j, j_max), 0)

    kv_spec = pl.BlockSpec((pl.Squeezed(), pl.Squeezed(), tk, hd), kv_index)

    return pl.pallas_call(
        partial(_flash_attn_kernel, tq=tq, tk=tk),
        out_shape=jax.ShapeDtypeStruct((B, H, T, hd), q.dtype),
        grid_spec=pltpu.PrefetchScalarGridSpec(
            num_scalar_prefetch=0,
            grid=grid,
            in_specs=[q_spec, kv_spec, kv_spec],
            out_specs=o_spec,
            scratch_shapes=[
                pltpu.VMEM((tq, 1), jnp.float32),    # running max
                pltpu.VMEM((tq, 1), jnp.float32),    # running denominator
                pltpu.VMEM((tq, hd), jnp.float32),   # output accumulator
            ],
        ),
        compiler_params=pltpu.CompilerParams(
            dimension_semantics=("parallel", "parallel", "parallel", "arbitrary"),
            vmem_limit_bytes=hw["vmem_limit"]),
    )(q, k, v)


# --------------------------------------------------------------------------
# 3) Output projection: out[b, t, n] = sum_h ctx[b, h, t, :] @ Wo[h] + bo.
#    Heads are a reduction grid axis (consumes ctx directly in head-split
#    layout -> no merge transpose); d_out is tiled (tn) so weight blocks stay
#    small on v7x.
# --------------------------------------------------------------------------
def _out_proj_kernel(ctx_ref, wo_ref, bo_ref, o_ref, acc_ref):
    h = pl.program_id(3)

    @pl.when(h == 0)
    def _init():
        acc_ref[...] = jnp.zeros_like(acc_ref)

    acc_ref[...] += jnp.dot(ctx_ref[...], wo_ref[...],
                            preferred_element_type=jnp.float32)

    @pl.when(h == pl.num_programs(3) - 1)
    def _finalize():
        o_ref[...] = (acc_ref[...] + bo_ref[...].astype(jnp.float32)
                      ).astype(o_ref.dtype)


def _out_projection(ctx, wo_h, bo2, *, hw):
    B, H, T, hd = ctx.shape
    d_out = wo_h.shape[-1]
    tm = _pick_tile(T, hw["proj_tiles"])
    tn = _pick_tile(d_out, hw["proj_tiles"])
    grid = (B, T // tm, d_out // tn, H)       # head reduction innermost

    return pl.pallas_call(
        _out_proj_kernel,
        out_shape=jax.ShapeDtypeStruct((B, T, d_out), ctx.dtype),
        grid_spec=pltpu.PrefetchScalarGridSpec(
            num_scalar_prefetch=0,
            grid=grid,
            in_specs=[
                pl.BlockSpec((pl.Squeezed(), pl.Squeezed(), tm, hd),
                             lambda b, i, n, h: (b, h, i, 0)),
                pl.BlockSpec((pl.Squeezed(), hd, tn),
                             lambda b, i, n, h: (h, 0, n)),
                pl.BlockSpec((1, tn), lambda b, i, n, h: (0, n)),
            ],
            out_specs=pl.BlockSpec((pl.Squeezed(), tm, tn),
                                   lambda b, i, n, h: (b, i, n)),
            scratch_shapes=[pltpu.VMEM((tm, tn), jnp.float32)],
        ),
        compiler_params=pltpu.CompilerParams(
            dimension_semantics=("parallel", "parallel", "parallel", "arbitrary"),
            vmem_limit_bytes=hw["vmem_limit"]),
    )(ctx, wo_h, bo2)


# --------------------------------------------------------------------------
# Full forward (matches MultiHeadAttention.forward, eval mode)
# --------------------------------------------------------------------------
def multi_head_attention(x, wq, wk, wv, wo, bo, *, num_heads):
    """x: (B, T, d_in); wq/wk/wv: (d_in, d_out); wo: (d_out, d_out); bo: (d_out,)."""
    B, T, d_in = x.shape
    d_out = wq.shape[1]
    assert d_out % num_heads == 0, "d_out must be divisible by num_heads"
    hd = d_out // num_heads
    scale = 1.0 / math.sqrt(hd)
    hw = _hw_params()

    # Pad long ragged T to a multiple of 128 so tiling never degrades to one
    # giant block; causal masking makes padded key columns self-masking and
    # padded output rows are sliced off below.
    Tp = T if T <= 128 else _round_up(T, 128)
    if Tp != T:
        x = jnp.pad(x, ((0, 0), (0, Tp - T), (0, 0)))

    # Weight-only re-layouts (activations are never transposed/relaid out):
    #   wq/wk/wv (d_in, d_out) -> per-head (H, d_in, hd), fused along N -> (H, d_in, 3*hd)
    #   wo       (d_out, d_out) -> (H, hd, d_out)   (pure reshape)
    def to_heads(w):
        return w.reshape(d_in, num_heads, hd).transpose(1, 0, 2)
    wqkv = jnp.concatenate([to_heads(wq), to_heads(wk), to_heads(wv)], axis=-1)
    wo_h = wo.reshape(num_heads, hd, d_out)
    bo2 = bo.reshape(1, d_out)

    q, k, v = _qkv_projection(x, wqkv, scale,
                              num_heads=num_heads, head_dim=hd, hw=hw)
    ctx = _flash_attention(q, k, v, hw=hw)
    out = _out_projection(ctx, wo_h, bo2, hw=hw)

    if Tp != T:
        out = out[:, :T, :]
    # TODO(synk): attention-weight dropout is identity (eval / dropout=0.0);
    # training-time stochastic dropout is not implemented.
    # TODO(synk): for head_dim < 128, pairing two heads per flash grid step
    # would make q/k/v/ctx stores lane-dense; skipped for simplicity.
    return out


# --------------------------------------------------------------------------
# Pure-JAX reference mirroring the PyTorch forward exactly.
# --------------------------------------------------------------------------
def _reference_mha(x, wq, wk, wv, wo, bo, *, num_heads):
    B, T, d_in = x.shape
    d_out = wq.shape[1]
    hd = d_out // num_heads
    q = (x @ wq).reshape(B, T, num_heads, hd).transpose(0, 2, 1, 3)
    k = (x @ wk).reshape(B, T, num_heads, hd).transpose(0, 2, 1, 3)
    v = (x @ wv).reshape(B, T, num_heads, hd).transpose(0, 2, 1, 3)
    scores = jnp.einsum('bhtd,bhsd->bhts', q, k)
    mask = jnp.triu(jnp.ones((T, T), dtype=bool), k=1)
    scores = jnp.where(mask, -jnp.inf, scores)
    w = jax.nn.softmax(scores / math.sqrt(hd), axis=-1)
    ctx = jnp.einsum('bhts,bhsd->bhtd', w, v).transpose(0, 2, 1, 3).reshape(B, T, d_out)
    return ctx @ wo + bo


if __name__ == "__main__":
    # Small shapes consistent with the module's forward: x of shape (B, T, d_in)
    B, T = 2, 8
    d_in, d_out = 32, 32
    num_heads = 4                     # head_dim = 8
    dropout = 0.0                     # inference: dropout is identity

    key = jax.random.PRNGKey(0)
    kx, kq, kk, kv, ko, kb = jax.random.split(key, 6)

    x = jax.random.normal(kx, (B, T, d_in), dtype=jnp.float32)
    # nn.Linear weights are (out, in); store pre-transposed as (in, out)
    wq = jax.random.normal(kq, (d_in, d_out), dtype=jnp.float32) * 0.1
    wk = jax.random.normal(kk, (d_in, d_out), dtype=jnp.float32) * 0.1
    wv = jax.random.normal(kv, (d_in, d_out), dtype=jnp.float32) * 0.1
    wo = jax.random.normal(ko, (d_out, d_out), dtype=jnp.float32) * 0.1
    bo = jax.random.normal(kb, (d_out,), dtype=jnp.float32) * 0.1

    out = multi_head_attention(x, wq, wk, wv, wo, bo, num_heads=num_heads)
    out = jax.block_until_ready(out)

    ref = _reference_mha(x, wq, wk, wv, wo, bo, num_heads=num_heads)
    assert out.shape == (B, T, d_out)
    # Tolerance accounts for the EUP approximate reciprocal in the softmax finalize.
    assert jnp.allclose(out, ref, atol=2e-3, rtol=2e-3), "mismatch vs reference"

    print("KERNEL_OK")
</pallas_src>

<mosaic_0001>
module attributes {stable_mosaic.version = 11 : i64} {
  func.func @_qkv_proj_kernel(%arg0: i32, %arg1: i32, %arg2: i32, %arg3: memref<1x8x32xf32, #tpu.memory_space<vmem>>, %arg4: memref<1x32x24xf32, #tpu.memory_space<vmem>>, %arg5: memref<1x1x8x8xf32, #tpu.memory_space<vmem>>, %arg6: memref<1x1x8x8xf32, #tpu.memory_space<vmem>>, %arg7: memref<1x1x8x8xf32, #tpu.memory_space<vmem>>) attributes {dimension_semantics = [#tpu.dimension_semantics<parallel>, #tpu.dimension_semantics<parallel>, #tpu.dimension_semantics<parallel>], iteration_bounds = array<i64: 2, 1, 4>, scalar_prefetch = 0 : i64, scratch_operands = 0 : i64, tpu.core_type = #tpu.core_type<tc>, window_params = [{transform_indices = @transform_0, window_bounds = array<i64: 1, 8, 32>}, {transform_indices = @transform_1, window_bounds = array<i64: 1, 32, 24>}, {transform_indices = @transform_2, window_bounds = array<i64: 1, 1, 8, 8>}, {transform_indices = @transform_3, window_bounds = array<i64: 1, 1, 8, 8>}, {transform_indices = @transform_4, window_bounds = array<i64: 1, 1, 8, 8>}]} {
    %c0 = arith.constant 0 : index
    %c0_0 = arith.constant 0 : index
    %c0_1 = arith.constant 0 : index
    %0 = vector.load %arg3[%c0, %c0_0, %c0_1] : memref<1x8x32xf32, #tpu.memory_space<vmem>>, vector<1x8x32xf32>
    %1 = vector.shape_cast %0 : vector<1x8x32xf32> to vector<8x32xf32>
    %c0_2 = arith.constant 0 : index
    %c0_3 = arith.constant 0 : index
    %c0_4 = arith.constant 0 : index
    %2 = vector.load %arg4[%c0_2, %c0_3, %c0_4] : memref<1x32x24xf32, #tpu.memory_space<vmem>>, vector<1x32x24xf32>
    %3 = vector.shape_cast %2 : vector<1x32x24xf32> to vector<32x24xf32>
    %cst = arith.constant dense<0.000000e+00> : vector<8x24xf32>
    %4 = tpu.matmul %1, %3, %cst {dimension_numbers = #tpu.dot_dimension_numbers<[1], [0], [0], [1], [0, 0, 1, 1], [], []>} : vector<8x32xf32>, vector<32x24xf32>, vector<8x24xf32> -> vector<8x24xf32>
    %5 = vector.extract_strided_slice %4 {offsets = [0, 0], sizes = [8, 8], strides = [1, 1]} : vector<8x24xf32> to vector<8x8xf32>
    %cst_5 = arith.constant 0.353553385 : f32
    %6 = vector.broadcast %cst_5 : f32 to vector<8x8xf32>
    %7 = arith.mulf %5, %6 : vector<8x8xf32>
    %c0_6 = arith.constant 0 : index
    %c0_7 = arith.constant 0 : index
    %c0_8 = arith.constant 0 : index
    %c0_9 = arith.constant 0 : index
    %8 = vector.load %arg5[%c0_6, %c0_7, %c0_8, %c0_9] : memref<1x1x8x8xf32, #tpu.memory_space<vmem>>, vector<1x1x8x8xf32>
    %9 = vector.shape_cast %8 : vector<1x1x8x8xf32> to vector<8x8xf32>
    %10 = vector.shape_cast %7 : vector<8x8xf32> to vector<1x1x8x8xf32>
    tpu.vector_store %arg5[%c0_6, %c0_7, %c0_8, %c0_9], %10 {strides = array<i32>} : memref<1x1x8x8xf32, #tpu.memory_space<vmem>>, vector<1x1x8x8xf32>,
    %11 = vector.extract_strided_slice %4 {offsets = [0, 8], sizes = [8, 8], strides = [1, 1]} : vector<8x24xf32> to vector<8x8xf32>
    %c0_10 = arith.constant 0 : index
    %c0_11 = arith.constant 0 : index
    %c0_12 = arith.constant 0 : index
    %c0_13 = arith.constant 0 : index
    %12 = vector.load %arg6[%c0_10, %c0_11, %c0_12, %c0_13] : memref<1x1x8x8xf32, #tpu.memory_space<vmem>>, vector<1x1x8x8xf32>
    %13 = vector.shape_cast %12 : vector<1x1x8x8xf32> to vector<8x8xf32>
    %14 = vector.shape_cast %11 : vector<8x8xf32> to vector<1x1x8x8xf32>
    tpu.vector_store %arg6[%c0_10, %c0_11, %c0_12, %c0_13], %14 {strides = array<i32>} : memref<1x1x8x8xf32, #tpu.memory_space<vmem>>, vector<1x1x8x8xf32>,
    %15 = vector.extract_strided_slice %4 {offsets = [0, 16], sizes = [8, 8], strides = [1, 1]} : vector<8x24xf32> to vector<8x8xf32>
    %c0_14 = arith.constant 0 : index
    %c0_15 = arith.constant 0 : index
    %c0_16 = arith.constant 0 : index
    %c0_17 = arith.constant 0 : index
    %16 = vector.load %arg7[%c0_14, %c0_15, %c0_16, %c0_17] : memref<1x1x8x8xf32, #tpu.memory_space<vmem>>, vector<1x1x8x8xf32>
    %17 = vector.shape_cast %16 : vector<1x1x8x8xf32> to vector<8x8xf32>
    %18 = vector.shape_cast %15 : vector<8x8xf32> to vector<1x1x8x8xf32>
    tpu.vector_store %arg7[%c0_14, %c0_15, %c0_16, %c0_17], %18 {strides = array<i32>} : memref<1x1x8x8xf32, #tpu.memory_space<vmem>>, vector<1x1x8x8xf32>,
    return
  }
  func.func @transform_0(%arg0: i32, %arg1: i32, %arg2: i32) -> (i32, i32, i32) {
    %c0_i32 = arith.constant 0 : i32
    %c0_i32_0 = arith.constant 0 : i32
    return %arg0, %arg1, %c0_i32 : i32, i32, i32
  }
  func.func @transform_1(%arg0: i32, %arg1: i32, %arg2: i32) -> (i32, i32, i32) {
    %c0_i32 = arith.constant 0 : i32
    %c0_i32_0 = arith.constant 0 : i32
    %c0_i32_1 = arith.constant 0 : i32
    return %arg2, %c0_i32, %c0_i32_0 : i32, i32, i32
  }
  func.func @transform_2(%arg0: i32, %arg1: i32, %arg2: i32) -> (i32, i32, i32, i32) {
    %c0_i32 = arith.constant 0 : i32
    %c0_i32_0 = arith.constant 0 : i32
    return %arg0, %arg2, %arg1, %c0_i32 : i32, i32, i32, i32
  }
  func.func @transform_3(%arg0: i32, %arg1: i32, %arg2: i32) -> (i32, i32, i32, i32) {
    %c0_i32 = arith.constant 0 : i32
    %c0_i32_0 = arith.constant 0 : i32
    return %arg0, %arg2, %arg1, %c0_i32 : i32, i32, i32, i32
  }
  func.func @transform_4(%arg0: i32, %arg1: i32, %arg2: i32) -> (i32, i32, i32, i32) {
    %c0_i32 = arith.constant 0 : i32
    %c0_i32_0 = arith.constant 0 : i32
    return %arg0, %arg2, %arg1, %c0_i32 : i32, i32, i32, i32
  }
}

</mosaic_0001>

<bundles_post_ra>
// kernel: tpu_custom_call.1
= control target key start
LH: loop header
LB: loop body
LE: loop exit
PB: predicated region body
PF: predicated region fallthrough
CT: control target
= control target key end

     0   :  { %10 = vsyncpa [#allocation3], 0  ;;  %s1095_s0 = inlined_call_operand.vmem [shape: f32[2,8,32], index: 0, kind: input, shape index: {}]   ;;  %s1096_s1 = inlined_call_operand.vmem [shape: f32[4,32,24], index: 1, kind: input, shape index: {}]   ;;  %s1097_s2 = inlined_call_operand.hbm [shape: f32[2,4,8,8], index: 2, kind: output, shape index: {0}]   ;;  %s1098_s3 = inlined_call_operand.hbm [shape: f32[2,4,8,8], index: 3, kind: output, shape index: {1}]   ;;  %s1099_s4 = inlined_call_operand.hbm [shape: f32[2,4,8,8], index: 4, kind: output, shape index: {2}]  }
   0x1   :  { %12 = vsyncpa [#allocation3 + $0x1], 0 }
   0x2   :  { %13 = vsyncpa [#allocation5], 0 }
   0x3   :  { %15 = vsyncpa [#allocation5 + $0x1], 0  ;;  %s888_s15 = smov 0   ;;  %s890_s16 = smov 0  }
   0x4   :  { %s892_s17 = smov 0   ;;  %s894_s18 = smov 0  }
   0x5   :  { %s896_s19 = smov 0   ;;  %s898_s20 = smov 0  }
   0x6   :  { %s900_s21 = smov 0   ;;  %s902_s22 = smov 0  }
   0x7 LB: > { %s581_s23 = sadd.s32 4294967295, %s854_s22   ;;  %s1100_s24 = sadd.s32 4294967294, %s854_s22   ;;  %s854_s22 = sphi %s902_s22, %s21_s22   ;;  %s850_s21 = sphi %s900_s21, %s1114_s21   ;;  %s846_s20 = sphi %s898_s20, %s1113_s20   ;;  %s842_s19 = sphi %s896_s19, %s1112_s19   ;;  %s838_s18 = sphi %s894_s18, %s1111_s18   ;;  %s834_s17 = sphi %s892_s17, %s1110_s17   ;;  %s830_s16 = sphi %s890_s16, %s1109_s16   ;;  %s826_s15 = sphi %s888_s15, %s1108_s15  }
   0x8   : > { %s33_s25 = sadd.s32 1, %s846_s20  ;;  %s40_s26 = sadd.s32 1, %s850_s21 }
   0x9   : > { %p34_p0 = scmp.ge.s32.totalorder %s33_s25, 4  ;;  %p115_p1 = scmp.ne.s32.totalorder %s834_s17, %s830_s16 }
   0xa   : > { %p116_p2 = scmp.eq.s32.totalorder %s581_s23, 7  ;;  %p121_p5 = scmp.ne.s32.totalorder %s830_s16, %s826_s15 }
   0xb   : > { %s1116_s25 = smov (%p34_p0, %s33_s25), 0  ;;  %s1118_s26 = smov (!%p34_p0, %s40_s26), %s850_s21 }
   0xc   : > { %s99_s27 = ssub.s32 %s846_s20, %s1116_s25  ;;  %p941_p3 = por %p116_p2, %p115_p1 }
   0xd   : > { %p42_p4 = scmp.ge.s32.totalorder %s1118_s26, 2  ;;  %p122_p6 = scmp.eq.s32.totalorder %s1100_s24, 7 }
   0xe   : > { %p585_p7 = scmp.ge.s32.totalorder %s854_s22, 1  ;;  %p218_p9 = scmp.lt.s32.totalorder %s854_s22, 9 }
   0xf   : > { %s1120_s26 = smov (%p42_p4, %s1118_s26), 0  ;;  %p952_p8 = por %p122_p6, %p121_p5 }
  0x10   : > { %s98_s30 = ssub.s32 %s850_s21, %s1120_s26  ;;  %s105_s5 = sadd.s32 1, %s834_s17 }
  0x11   : > { %s100_s6 = sor.u32 %s99_s27, %s98_s30  ;;  %p219_p10 = pnand %p585_p7, %p218_p9 }
  0x12   : > { %p103_p11 = scmp.eq.s32.totalorder %s100_s6, 0  ;;  %p268_p12 = scmp.lt.s32.totalorder (!%p219_p10), %s838_s18, 3 }
  0x13   : > { %222 = sbr.rel (%p219_p10) target bundleno = 381 (0x17d), region = 28  ;;  %p261_p13 = scmp.lt.s32.totalorder (!%p219_p10), %s842_s19, 1 }
  0x14   : > { %s961_s7 = scalar_select %p103_p11, %s834_s17, %s105_s5  }
  0x15   : > { %s244_s6 = sand.u32 (!%p219_p10), 1, %s830_s16  }
  0x18   : > { %v856_v0 = vmov 0.0   ;;  %vm857_vm0 = vmmov 0   ;;  %s269_s8 = scalar_select %p268_p12, %s838_s18, 3  ;;  %vm278_vm1 = vcmask 261120   ;;  %vm353_vm2 = vcmask 64512  }
  0x19   : > { %610 = vmatprep.subr.mxu0 %v856_v0  ;;  %618 = vmatprep.mubr.msk.f32.mxu0 %vm857_vm0, %v856_v0  ;;  %s262_s9 = scalar_select %p261_p13, %s842_s19, 1 }
  0x1a   : > { %s604_s10 = sshll.u32 %s269_s8, 5  ;;  %s596_s8 = sshll.u32 %s842_s19, 2 }
  0x1b   : > { %s272_s13 = scalar_lea.vmem %s1096_s1, %s604_s10  ;;  %s589_s14 = sshll.u32 %s262_s9, 3 }
  0x1c   : > { %v277_v1 = vld [vmem:[%s272_s13 + $0x18] sm:$0xff]  ;;  %v276_v2 = vld [vmem:[%s272_s13 + $0x10] sm:$0xff]  ;;  %v275_v3 = vld [vmem:[%s272_s13 + $0x8] sm:$0xff]  ;;  %s267_s5 = scalar_lea.vmem %s1095_s0, %s589_s14  ;;  %s975_s9 = sshll.u32 %s244_s6, 3 }
  0x1d   : > { %611 = vmatpush3.msra.mxu0 %v277_v1  ;;  %v274_v4 = vld [vmem:[%s272_s13] sm:$0xff]  ;;  %s387_s10 = sadd.s32 %s838_s18, %s596_s8  ;;  %s246_s12 = scalar_lea.vmem [#allocation2], %s975_s9 }
  0x1e   : > { %612 = vmatprep.subr.mxu0 %v856_v0  ;;  %v273_v5 = vld [vmem:[%s267_s5] sm:$0xff]  ;;  %s978_s11 = sshll.u32 %s387_s10, 7  ;;  %s391_s14 = sshll.u32 %s246_s12, 4  ;;  %s392_s14 = int_to_ptr.vmem [resolvable:$true] %s391_s14 }
  0x1f   : > { %613 = vmatpush3.msra.mxu0 %v276_v2  ;;  %s858_s13 = smov 120   ;;  %s985_s5 = scalar_lea.hbm %s1097_s2, %s978_s11 }
  0x20   : > { %614 = vmatprep.subr.mxu0 %v856_v0  ;;  %s365_s18 = scalar_lea.sflag [#allocation3], %s244_s6  ;;  %s706_s19 = scalar_lea.vmem %s392_s14, 128 }
  0x21   : > { %615 = vmatpush3.msra.mxu0 %v275_v3  ;;  %p707_p0 = scmp.ne.s32.totalorder %s392_s14, %s706_s19  ;;  %s859_s8 = smov [#allocation2]  }
  0x22   : > { %616 = vmatprep.subr.mxu0 %v856_v0  ;;  %s710_s10 = sshll.u32 %s859_s8, 4  ;;  %s711_s10 = int_to_ptr.vmem [resolvable:$false] %s710_s10 }
  0x23   : > { %617 = vmatpush3.msra.mxu0 %v274_v4  ;;  %p708_p1 = pnand %p707_p0, %p941_p3  ;;  %s712_s24 = scalar_lea.vmem %s711_s10, 256 }
  0x24   : > { %619 = vmatmul.mubr.msk.f32.vlgmr.msra.gmra.mxu0 %vm278_vm1, %v273_v5  ;;  %p713_p4 = scmp.lt.s32.totalorder %s392_s14, %s711_s10  ;;  %p714_p5 = scmp.lt.s32.totalorder %s712_s24, %s706_s19 }
  0x25   : > { %p709_p2 = pneg %p708_p1 }
  0x26   : > { %p715_p6 = por %p714_p5, %p713_p4 }
  0x28   : > { %p716_p7 = pnand %p715_p6, %p709_p2 }
  0xe4   : > { %v348_v6 = vpop.f32.mrf.mxu0 }
  0xe5   : > { %v352_v7 = vmul.f32 0.35355338, %v348_v6  ;;  %356 = vrot.lane.b32.xlu0 %v348_v6, %s858_s13 }
  0xe6   : > { %v620_v8 = vpop.f32.mrf.mxu0 }
  0xe7   : > { %354 = vst.msk [vmem:[%s246_s12] sm:$0xff] %vm353_vm2, %v352_v7 }
  0xe8   : > { %719 = shalt.err (!%p716_p7)
}
  0xe9   : > { %s720_s12 = scalar_lea.hbm %s985_s5, 128  ;;  %s724_s27 = scalar_lea.hbm %s1097_s2, 1024 }
  0xea   : > { %p721_p9 = scmp.ne.s32.totalorder %s985_s5, %s720_s12  ;;  %p725_p12 = scmp.lt.s32.totalorder %s985_s5, %s1097_s2 }
  0xeb   : > { %p726_p13 = scmp.lt.s32.totalorder %s724_s27, %s720_s12 }
  0xec   : > { %p722_p10 = pnand %p721_p9, %p941_p3 }
  0xed   : > { %p727_p0 = por %p726_p13, %p725_p12 }
  0xee   : > { %p723_p11 = pneg %p722_p10 }
  0xf0   : > { %p728_p1 = pnand %p727_p0, %p723_p11 }
  0xf2   : > { %731 = shalt.err (!%p728_p1)
}
  0xf3   : > { %621 = dma.vmem_to_hbm [thread:$0]  (%p941_p3), %s392_s14, 128, %s985_s5, %s365_s18  }
  0xf4   : > { %s860_s24 = smov 112   ;;  %s1006_s19 = sand.u32 1, %s581_s23  }
  0xf5   : > { %360 = vrot.lane.b32.xlu0 %v348_v6, %s860_s24  ;;  %s253_s10 = scalar_lea.vmem [#allocation4], %s975_s9  ;;  %s1013_s27 = scalar_lea.hbm %s1098_s3, %s978_s11 }
  0xf6   : > { %s407_s12 = sshll.u32 %s253_s10, 4  ;;  %s1101_s14 = scalar_lea.vmem [#allocation6], %s975_s9  ;;  %s1015_s12 = int_to_ptr.vmem [resolvable:$true] %s407_s12 }
  0xf7   : > { %s423_s5 = sshll.u32 %s1101_s14, 4  ;;  %s732_s18 = scalar_lea.vmem %s1015_s12, 128  ;;  %s424_s5 = int_to_ptr.vmem [resolvable:$true] %s423_s5 }
  0xf8   : > { %p733_p2 = scmp.ne.s32.totalorder %s1015_s12, %s732_s18  ;;  %s861_s30 = smov [#allocation4]  }
  0xf9   : > { %s736_s8 = sshll.u32 %s861_s30, 4  ;;  %s737_s8 = int_to_ptr.vmem [resolvable:$false] %s736_s8 }
  0xfa   : > { %p734_p4 = pnand %p733_p2, %p941_p3  ;;  %s738_s24 = scalar_lea.vmem %s737_s8, 256 }
  0xfb   : > { %p739_p6 = scmp.lt.s32.totalorder %s1015_s12, %s737_s8  ;;  %p740_p7 = scmp.lt.s32.totalorder %s738_s24, %s732_s18 }
  0xfc   : > { %p735_p5 = pneg %p734_p4 }
  0xfd   : > { %p741_p9 = por %p740_p7, %p739_p6 }
  0xff   : > { %p742_p10 = pnand %p741_p9, %p735_p5 }
 0x157   : > { %v357_v9 = vpop.permute.xlu0 %356 }
 0x158   : > { %359 = vst.msk [vmem:[%s253_s10] sm:$0xff] %vm353_vm2, %v357_v9 }
 0x159   : > { %745 = shalt.err (!%p742_p10)
}
 0x15a   : > { %s746_s10 = scalar_lea.hbm %s1013_s27, 128  ;;  %s750_s30 = scalar_lea.hbm %s1098_s3, 1024 }
 0x15b   : > { %p747_p11 = scmp.ne.s32.totalorder %s1013_s27, %s746_s10  ;;  %p751_p0 = scmp.lt.s32.totalorder %s1013_s27, %s1098_s3 }
 0x15c   : > { %p752_p1 = scmp.lt.s32.totalorder %s750_s30, %s746_s10 }
 0x15d   : > { %p748_p12 = pnand %p747_p11, %p941_p3 }
 0x15e   : > { %p753_p2 = por %p752_p1, %p751_p0 }
 0x15f   : > { %p749_p13 = pneg %p748_p12 }
 0x161   : > { %p754_p4 = pnand %p753_p2, %p749_p13 }
 0x163   : > { %757 = shalt.err (!%p754_p4)
}
 0x164   : > { %s1104_s18 = scalar_lea.sflag [#allocation5], %s1006_s19  ;;  %s421_s14 = scalar_lea.hbm %s1099_s4, %s978_s11 }
 0x165   : > { %622 = dma.vmem_to_hbm [thread:$0]  (%p941_p3), %s1015_s12, 128, %s1013_s27, %s1104_s18  }
 0x166   : > { %s1105_s23 = scalar_lea.vmem [#allocation6], %s975_s9  ;;  %s758_s10 = scalar_lea.vmem %s424_s5, 128 }
 0x167   : > { %v361_v10 = vpop.permute.xlu0 %360  ;;  %p759_p5 = scmp.ne.s32.totalorder %s424_s5, %s758_s10  ;;  %s862_s6 = smov [#allocation6]  }
 0x168   : > { %363 = vst.msk [vmem:[%s1105_s23] sm:$0xff] %vm353_vm2, %v361_v10  ;;  %s762_s13 = sshll.u32 %s862_s6, 4  ;;  %s763_s13 = int_to_ptr.vmem [resolvable:$false] %s762_s13 }
 0x169   : > { %p760_p6 = pnand %p759_p5, %p941_p3  ;;  %s764_s30 = scalar_lea.vmem %s763_s13, 256 }
 0x16a   : > { %p765_p9 = scmp.lt.s32.totalorder %s424_s5, %s763_s13  ;;  %p766_p10 = scmp.lt.s32.totalorder %s764_s30, %s758_s10 }
 0x16b   : > { %p761_p7 = pneg %p760_p6 }
 0x16c   : > { %p767_p11 = por %p766_p10, %p765_p9 }
 0x16e   : > { %p768_p12 = pnand %p767_p11, %p761_p7 }
 0x170   : > { %771 = shalt.err (!%p768_p12)
}
 0x171   : > { %s772_s12 = scalar_lea.hbm %s421_s14, 128  ;;  %s776_s27 = scalar_lea.hbm %s1099_s4, 1024 }
 0x172   : > { %p773_p13 = scmp.ne.s32.totalorder %s421_s14, %s772_s12  ;;  %p777_p2 = scmp.lt.s32.totalorder %s421_s14, %s1099_s4 }
 0x173   : > { %p778_p4 = scmp.lt.s32.totalorder %s776_s27, %s772_s12 }
 0x174   : > { %p774_p0 = pnand %p773_p13, %p941_p3 }
 0x175   : > { %p779_p5 = por %p778_p4, %p777_p2 }
 0x176   : > { %p775_p1 = pneg %p774_p0 }
 0x178   : > { %p780_p6 = pnand %p779_p5, %p775_p1 }
 0x17a   : > { %783 = shalt.err (!%p780_p6)
}
 0x17b   : > { %s1106_s24 = scalar_lea.sflag [#allocation5], %s1006_s19 }
 0x17c   : > { %623 = dma.vmem_to_hbm [thread:$0]  (%p941_p3), %s424_s5, 128, %s421_s14, %s1106_s24  }
 0x17d PF: > { %p637_p7 = scmp.ge.s32.totalorder %s854_s22, 2  ;;  %s435_s23 = sand.u32 1, %s826_s15  }
 0x17e   : > { %s436_s10 = scalar_lea.sflag [#allocation3], %s435_s23 }
 0x17f   : > { %p628_p9 = pnand %p637_p7, %p952_p8 }
 0x181   : > { %p629_p10 = pneg %p628_p9 }
 0x183   : > { %817 = dma.done.wait (%p629_p10), %s436_s10, 128  }
 0x184   : > { %819 = vsyncadd (%p629_p10), %s436_s10, 4294967168  ;;  %s1107_s6 = sadd.s32 4294967294, %s854_s22  }
 0x185   : > { %s444_s13 = sand.u32 1, %s1107_s6  }
 0x186   : > { %s445_s30 = scalar_lea.sflag [#allocation5], %s444_s13 }
 0x187   : > { %821 = dma.done.wait (%p629_p10), %s445_s30, 256  }
 0x188   : > { %823 = vsyncadd (%p629_p10), %s445_s30, 4294967040  ;;  %s21_s22 = sadd.s32 1, %s854_s22   ;;  %s1108_s15 = smov %s830_s16 }
 0x189   : > { %p18_p3 = scmp.ge.s32.totalorder %s21_s22, 10   ;;  %s1109_s16 = smov %s834_s17 }
 0x18a   : > { %s1110_s17 = smov %s961_s7  ;;  %s1111_s18 = smov %s846_s20 }
 0x18b   : > { %s1112_s19 = smov %s850_s21  ;;  %s1113_s20 = smov %s1116_s25 }
 0x18c   : > { %s1114_s21 = smov %s1120_s26  ;;  %20 = sbr.rel (!%p18_p3) target bundleno = 7 (0x7), region = 98 }
 0x191   :  { %459 = vsyncpa [#allocation3], 1 }
 0x192   :  { %461 = vsyncpa [#allocation3 + $0x1], 1 }
 0x193   :  { %462 = vsyncpa [#allocation5], 1 }
 0x194   :  { %464 = vsyncpa [#allocation5 + $0x1], 1 }

</bundles_post_ra>
